<compile_context>
chip_gen: v7x
topology: tpu7x:2x2x1
jax: 0.10.0
libtpu: 0.0.40
codegen_flags: <defaults>
</compile_context>

<pallas_src>
import jax
import jax.numpy as jnp
from jax.experimental import pallas as pl
from jax.experimental.pallas import tpu as pltpu


def mlp_kernel(x_ref, w1t_ref, aux_ref, b2_ref, o_ref):
    # x_ref  : (2, TM)     feature-major tile; batch lives on the lane axis.
    # w1t_ref: (H, 2)      layer-1 weight, feature-major (lhs of the MXU matmul).
    # aux_ref: (H, 2)      packed [b1 | w2] columns.
    # b2_ref : (1,) SMEM   layer-2 bias scalar.
    b1 = aux_ref[:, 0:1]                    # (H, 1)
    w2 = aux_ref[:, 1:2]                    # (H, 1)
    b2 = b2_ref[0]                          # scalar

    # Layer 1 on the MXU (K=2 contraction, f32 accumulate, full precision).
    h = jnp.dot(
        w1t_ref[...], x_ref[...],
        preferred_element_type=jnp.float32,
        precision=jax.lax.Precision.HIGHEST,
    )                                       # (H, TM)
    h = jnp.maximum(h + b1, 0.0)            # bias + ReLU on VPU

    # Layer 2 (50 -> 1): broadcast multiply + cross-sublane reduce (XLU).
    y = jnp.sum(h * w2, axis=0, keepdims=True) + b2        # (1, TM)

    # Sigmoid with exp + approximate reciprocal, both on the EUP slot.
    o_ref[...] = pl.reciprocal(1.0 + jnp.exp(-y), approx=True).astype(o_ref.dtype)


def torch_model_forward(x, w1, b1, w2, b2, *, tm=512):
    """Forward pass of Linear(2,50)->ReLU->Linear(50,1)->Sigmoid.

    x:  (N, 2) f32  (PyTorch (batch, in_features) layout)
    w1: (2, 50)  b1: (50,)  w2: (50, 1)  b2: (1,)
    Returns (N, 1) f32.
    """
    n = x.shape[0]
    hidden = w1.shape[1]
    n_pad = pl.cdiv(n, tm) * tm

    # Single fused transpose+pad; batch ends up on the lane axis.
    x_t = jnp.pad(x.T, ((0, 0), (0, n_pad - n)))            # (2, n_pad)

    w1t = w1.T                                               # (hidden, 2)
    aux = jnp.stack([b1, w2.reshape(hidden)], axis=1)        # (hidden, 2): [b1 | w2]
    b2v = b2.reshape(1).astype(jnp.float32)                  # (1,) SMEM scalar

    out_t = pl.pallas_call(
        mlp_kernel,
        out_shape=jax.ShapeDtypeStruct((1, n_pad), jnp.float32),
        grid_spec=pl.GridSpec(
            grid=(n_pad // tm,),
            in_specs=[
                pl.BlockSpec((2, tm), lambda i: (0, i)),          # x tile
                pl.BlockSpec((hidden, 2), lambda i: (0, 0)),      # w1^T (resident)
                pl.BlockSpec((hidden, 2), lambda i: (0, 0)),      # [b1 | w2] (resident)
                pl.BlockSpec(memory_space=pltpu.MemorySpace.SMEM),  # b2 scalar
            ],
            out_specs=pl.BlockSpec((1, tm), lambda i: (0, i)),    # lane-dense output
        ),
        compiler_params=pltpu.CompilerParams(
            dimension_semantics=("parallel",),   # batch tiles shard across TCs (v7x)
        ),
    )(x_t, w1t, aux, b2v)

    return out_t[0, :n].reshape(n, 1)


if __name__ == "__main__":
    key = jax.random.PRNGKey(0)
    k_x, k_w1, k_b1, k_w2, k_b2 = jax.random.split(key, 5)

    batch = 1000                      # -> 2 grid steps at tm=512 (+ tail padding)
    in_features, hidden, out_features = 2, 50, 1

    x = jax.random.normal(k_x, (batch, in_features), dtype=jnp.float32)
    w1 = jax.random.normal(k_w1, (in_features, hidden), dtype=jnp.float32) * 0.5
    b1 = jax.random.normal(k_b1, (hidden,), dtype=jnp.float32) * 0.1
    w2 = jax.random.normal(k_w2, (hidden, out_features), dtype=jnp.float32) * 0.5
    b2 = jax.random.normal(k_b2, (out_features,), dtype=jnp.float32) * 0.1

    out = torch_model_forward(x, w1, b1, w2, b2, tm=512)
    jax.block_until_ready(out)

    # Pure-JAX reference check (tolerance loosened for the EUP approx reciprocal).
    ref = jax.nn.sigmoid(jnp.maximum(x @ w1 + b1, 0.0) @ w2 + b2)
    assert out.shape == (batch, out_features)
    assert jnp.allclose(out, ref, atol=2e-3, rtol=2e-3), "mismatch vs reference"

    print("KERNEL_OK")
</pallas_src>

<mosaic_0001>
module attributes {stable_mosaic.version = 11 : i64} {
  func.func @mlp_kernel(%arg0: i32, %arg1: memref<2x512xf32, #tpu.memory_space<vmem>>, %arg2: memref<50x2xf32, #tpu.memory_space<vmem>>, %arg3: memref<50x2xf32, #tpu.memory_space<vmem>>, %arg4: memref<1xf32, #tpu.memory_space<smem>>, %arg5: memref<1x512xf32, #tpu.memory_space<vmem>>) attributes {dimension_semantics = [#tpu.dimension_semantics<parallel>], iteration_bounds = array<i64: 2>, scalar_prefetch = 0 : i64, scratch_operands = 0 : i64, tpu.core_type = #tpu.core_type<tc>, window_params = [{transform_indices = @transform_0, window_bounds = array<i64: 2, 512>}, {pipeline_mode = #tpu.pipeline_mode<synchronous>, transform_indices = @transform_1, window_bounds = array<i64: 50, 2>}, {pipeline_mode = #tpu.pipeline_mode<synchronous>, transform_indices = @transform_2, window_bounds = array<i64: 50, 2>}, {transform_indices = @transform_3, window_bounds = array<i64: 1>}, {transform_indices = @transform_4, window_bounds = array<i64: 1, 512>}]} {
    %c0 = arith.constant 0 : index
    %c0_0 = arith.constant 0 : index
    %0 = vector.load %arg3[%c0, %c0_0] : memref<50x2xf32, #tpu.memory_space<vmem>>, vector<50x1xf32>
    %c0_1 = arith.constant 0 : index
    %c1 = arith.constant 1 : index
    %1 = vector.load %arg3[%c0_1, %c1] : memref<50x2xf32, #tpu.memory_space<vmem>>, vector<50x1xf32>
    %c0_2 = arith.constant 0 : index
    %2 = memref.load %arg4[%c0_2] : memref<1xf32, #tpu.memory_space<smem>>
    %c0_3 = arith.constant 0 : index
    %c0_4 = arith.constant 0 : index
    %3 = vector.load %arg2[%c0_3, %c0_4] : memref<50x2xf32, #tpu.memory_space<vmem>>, vector<50x2xf32>
    %c0_5 = arith.constant 0 : index
    %c0_6 = arith.constant 0 : index
    %4 = vector.load %arg1[%c0_5, %c0_6] : memref<2x512xf32, #tpu.memory_space<vmem>>, vector<2x512xf32>
    %cst = arith.constant dense<0.000000e+00> : vector<50x512xf32>
    %5 = tpu.matmul %3, %4, %cst {dimension_numbers = #tpu.dot_dimension_numbers<[1], [0], [0], [1], [0, 0, 1, 1], [], []>, precision = #tpu.contract_precision<fp32>} : vector<50x2xf32>, vector<2x512xf32>, vector<50x512xf32> -> vector<50x512xf32>
    %6 = vector.broadcast %0 : vector<50x1xf32> to vector<50x512xf32>
    %7 = arith.addf %5, %6 : vector<50x512xf32>
    %cst_7 = arith.constant 0.000000e+00 : f32
    %8 = vector.broadcast %cst_7 : f32 to vector<50x512xf32>
    %9 = arith.maximumf %7, %8 : vector<50x512xf32>
    %10 = vector.broadcast %1 : vector<50x1xf32> to vector<50x512xf32>
    %11 = arith.mulf %9, %10 : vector<50x512xf32>
    %cst_8 = arith.constant dense<0.000000e+00> : vector<512xf32>
    %12 = vector.multi_reduction <add>, %11, %cst_8 [0] : vector<50x512xf32> to vector<512xf32>
    %13 = vector.shape_cast %12 : vector<512xf32> to vector<1x512xf32>
    %14 = vector.broadcast %2 : f32 to vector<1x512xf32>
    %15 = arith.addf %13, %14 : vector<1x512xf32>
    %cst_9 = arith.constant 0.000000e+00 : f32
    %16 = vector.broadcast %cst_9 : f32 to vector<1x512xf32>
    %17 = arith.subf %16, %15 : vector<1x512xf32>
    %18 = math.exp %17 : vector<1x512xf32>
    %cst_10 = arith.constant 1.000000e+00 : f32
    %19 = vector.broadcast %cst_10 : f32 to vector<1x512xf32>
    %20 = arith.addf %19, %18 : vector<1x512xf32>
    %21 = tpu.reciprocal %20 {approx = true} : vector<1x512xf32> -> vector<1x512xf32>
    %c0_11 = arith.constant 0 : index
    %c0_12 = arith.constant 0 : index
    %22 = vector.load %arg5[%c0_11, %c0_12] : memref<1x512xf32, #tpu.memory_space<vmem>>, vector<1x512xf32>
    tpu.vector_store %arg5[%c0_11, %c0_12], %21 {strides = array<i32>} : memref<1x512xf32, #tpu.memory_space<vmem>>, vector<1x512xf32>,
    return
  }
  func.func @transform_0(%arg0: i32) -> (i32, i32) {
    %c0_i32 = arith.constant 0 : i32
    %c0_i32_0 = arith.constant 0 : i32
    return %c0_i32, %arg0 : i32, i32
  }
  func.func @transform_1(%arg0: i32) -> (i32, i32) {
    %c0_i32 = arith.constant 0 : i32
    %c0_i32_0 = arith.constant 0 : i32
    %c0_i32_1 = arith.constant 0 : i32
    return %c0_i32, %c0_i32_0 : i32, i32
  }
  func.func @transform_2(%arg0: i32) -> (i32, i32) {
    %c0_i32 = arith.constant 0 : i32
    %c0_i32_0 = arith.constant 0 : i32
    %c0_i32_1 = arith.constant 0 : i32
    return %c0_i32, %c0_i32_0 : i32, i32
  }
  func.func @transform_3(%arg0: i32) -> i32 {
    %c0_i32 = arith.constant 0 : i32
    %c0_i32_0 = arith.constant 0 : i32
    return %c0_i32 : i32
  }
  func.func @transform_4(%arg0: i32) -> (i32, i32) {
    %c0_i32 = arith.constant 0 : i32
    %c0_i32_0 = arith.constant 0 : i32
    return %c0_i32, %arg0 : i32, i32
  }
}

</mosaic_0001>

<bundles_post_ra>
// kernel: tpu_custom_call.1
= control target key start
LH: loop header
LB: loop body
LE: loop exit
PB: predicated region body
PF: predicated region fallthrough
CT: control target
= control target key end

     0   :  { %s2897_s0 = inlined_call_operand.vmem [shape: f32[2,1024], index: 0, kind: input, shape index: {}]   ;;  %s2898_s1 = inlined_call_operand.vmem [shape: f32[50,2], index: 1, kind: input, shape index: {}]   ;;  %s2899_s2 = inlined_call_operand.vmem [shape: f32[50,2], index: 2, kind: input, shape index: {}]   ;;  %s2900_s3 = inlined_call_operand.<no memory space> [shape: f32[1], index: 3, kind: input, shape index: {}]   ;;  %s2901_s4 = inlined_call_operand.hbm [shape: f32[1,1024], index: 4, kind: output, shape index: {}]  }
   0x1   :  { %9 = sst [smem:[#allocation2]] %s2900_s3 }
   0x2   :  { %10 = vsyncpa [#allocation4], 0 }
   0x3   :  { %12 = vsyncpa [#allocation4 + $0x1], 0  ;;  %s2433_s17 = smov 0   ;;  %s2435_s18 = smov 0  }
   0x4   :  { %s2437_s19 = smov 0   ;;  %s2439_s20 = smov 0  }
   0x5 LB: > { %s2454_s3 = sadd.s32 4294967295, %s2397_s20   ;;  %s2087_s21 = sadd.s32 4294967294, %s2397_s20   ;;  %s2397_s20 = sphi %s2439_s20, %s2908_s20   ;;  %s2393_s19 = sphi %s2437_s19, %s2907_s19   ;;  %s2389_s18 = sphi %s2435_s18, %s2906_s18   ;;  %s2385_s17 = sphi %s2433_s17, %s2905_s17  }
   0x6   : > { %s2458_s22 = sadd.s32 1, %s2397_s20   ;;  %s114_s23 = sadd.s32 1, %s2393_s19 }
   0x7   : > { %s111_s24 = ssub.s32 %s2397_s20, %s2458_s22  ;;  %p124_p0 = scmp.ne.s32.totalorder %s2393_s19, %s2389_s18 }
   0x8   : > { %p112_p1 = scmp.eq.s32.totalorder %s111_s24, 0  ;;  %p125_p2 = scmp.eq.s32.totalorder %s2454_s3, 1 }
   0x9   : > { %p130_p3 = scmp.ne.s32.totalorder %s2389_s18, %s2385_s17  ;;  %p131_p4 = scmp.eq.s32.totalorder %s2087_s21, 1 }
   0xa   : > { %s2469_s25 = scalar_select %p112_p1, %s2393_s19, %s114_s23  }
   0xb   : > { %p2471_p5 = por %p125_p2, %p124_p0  ;;  %p2475_p6 = por %p131_p4, %p130_p3 }
   0xc   : > { %p2090_p7 = scmp.ge.s32.totalorder %s2397_s20, 1  ;;  %p167_p8 = scmp.lt.s32.totalorder %s2397_s20, 3 }
   0xe   : > { %p168_p9 = pnand %p2090_p7, %p167_p8 }
   0xf   : > { %s2092_s28 = sshll.u32 (!%p168_p9), %s2454_s3, 2  ;;  %v256_v0 = vlaneseq (!%p168_p9)  ;;  %v208_v1 = vld [vmem:[%s2898_s1] sm:$0xff] (!%p168_p9)  ;;  %v2399_v2 = vmov (!%p168_p9), 1983009808   ;;  %v2400_v4 = vmov (!%p168_p9), 0.0   ;;  %vm269_vm0 = vcmask (!%p168_p9), 15360  }
  0x10   : > { %171 = sbr.rel (%p168_p9) target bundleno = 488 (0x1e8), region = 36  ;;  %p2485_p10 = scmp.lt.s32.totalorder (!%p168_p9), %s2092_s28, 7  ;;  %v254_v3 = vunpack.c.l.s4 (!%p168_p9), %v2399_v2  ;;  %366 = vmatprep.mubr.f32.mxu0 (!%p168_p9), %v2400_v4  ;;  %1125 = vmatprep.mubr.f32.mxu1 (!%p168_p9), %v2400_v4  ;;  %v209_v5 = vld [vmem:[%s2898_s1 + $0x8] sm:$0xff] (!%p168_p9)  ;;  %v210_v6 = vld [vmem:[%s2898_s1 + $0x10] sm:$0xff] (!%p168_p9)  ;;  %v211_v7 = vld [vmem:[%s2898_s1 + $0x18] sm:$0xff] (!%p168_p9)  ;;  %v271_v9 = vsel (!%p168_p9), %vm269_vm0, %v208_v1, 0 }
  0x11   : > { %v2501_v8 = vshrl.u32 (!%p168_p9), %v256_v0, 7  ;;  %v274_v10 = vsel (!%p168_p9), %vm269_vm0, %v209_v5, 0  ;;  %v277_v11 = vsel (!%p168_p9), %vm269_vm0, %v210_v6, 0  ;;  %v2508_v13 = vand.u32 (!%p168_p9), 4294901760, %v271_v9  ;;  %v212_v20 = vld [vmem:[%s2898_s1 + $0x20] sm:$0xff] (!%p168_p9)  ;;  %v213_v25 = vld [vmem:[%s2898_s1 + $0x28] sm:$0xff] (!%p168_p9) }
  0x12   : > { %v255_v12 = vunpack.c.0.s8 (!%p168_p9), %v254_v3  ;;  %v2510_v14 = vand.u32 (!%p168_p9), 4294901760, %v274_v10  ;;  %v2512_v15 = vand.u32 (!%p168_p9), 4294901760, %v277_v11  ;;  %v280_v16 = vsel (!%p168_p9), %vm269_vm0, %v211_v7, 0  ;;  %v214_v39 = vld [vmem:[%s2898_s1 + $0x30] sm:$0x3] (!%p168_p9)  ;;  %s207_s23 = sld [smem:[#allocation2]] (!%p168_p9) }
  0x13   : > { %v2517_v18 = vsub.f32 (!%p168_p9), %v271_v9, %v2508_v13  ;;  %vm291_vm1 = vcmask (!%p168_p9), 1041408   ;;  %v2534_v24 = vand.u32 (!%p168_p9), 4294901760, %v280_v16  ;;  %v283_v29 = vsel (!%p168_p9), %vm269_vm0, %v212_v20, 0  ;;  %s190_s24 = sand.u32 (!%p168_p9), 1, %s2389_s18   ;;  %s2099_s29 = sshll.u32 (!%p168_p9), %s2454_s3, 6 }
  0x14   : > { %v258_v17 = vsub.s32 (!%p168_p9), %v255_v12, %v2501_v8  ;;  %v2520_v19 = vsub.f32 (!%p168_p9), %v274_v10, %v2510_v14  ;;  %v2532_v23 = vsub.f32 (!%p168_p9), %v277_v11, %v2512_v15  ;;  %v286_v34 = vsel (!%p168_p9), %vm269_vm0, %v213_v25, 0  ;;  %s2855_s8 = scalar_lea.hbm (!%p168_p9), %s2901_s4, %s2099_s29  ;;  %s2014_s9 = scalar_lea.sflag (!%p168_p9), [#allocation4], %s190_s24 }
  0x15   : > { %v2529_v22 = vand.u32 (!%p168_p9), 4294901760, %v2517_v18  ;;  %v2553_v37 = vsub.f32 (!%p168_p9), %v280_v16, %v2534_v24  ;;  %v2555_v38 = vand.u32 (!%p168_p9), 4294901760, %v283_v29  ;;  %v2572_v49 = vand.u32 (!%p168_p9), 4294901760, %v286_v34  ;;  %s2404_s3 = smov (!%p168_p9), [#allocation3]  }
  0x16   : > { %v2540_v28 = vand.u32 (!%p168_p9), 4294901760, %v2520_v19  ;;  %v2550_v36 = vand.u32 (!%p168_p9), 4294901760, %v2532_v23  ;;  %v289_v50 = vsel (!%p168_p9), %vm269_vm0, %v214_v39, 0  ;;  %v2401_v39 = vmov (!%p168_p9), 0   ;;  %s2339_s11 = sshll.u32 (!%p168_p9), %s2404_s3, 4  ;;  %s2340_s11 = int_to_ptr.vmem [resolvable:$false] %s2339_s11 }
  0x17   : > { %s2910_s28 = smov (!%p2485_p10, %s2092_s28), 7  ;;  %v370_v30 = vsub.f32 %v2517_v18, %v2529_v22  ;;  %v2589_v57 = vand.u32 4294901760, %v2553_v37  ;;  %v2592_v58 = vsub.f32 %v283_v29, %v2555_v38  ;;  %v2614_v6 = vsub.f32 %v286_v34, %v2572_v49  ;;  %v200_v34 = vld [vmem:[%s2899_s2] sm:$0xff]  ;;  %2312 = vset.pattern.permute.xlu0 %v2401_v39  ;;  %2313 = vset.pattern.permute.xlu1 %v2401_v39 }
  0x18   : > { %s2093_s12 = sshll.u32 %s2910_s28, 1  ;;  %v381_v43 = vsub.f32 %v2520_v19, %v2540_v28  ;;  %v392_v56 = vsub.f32 %v2532_v23, %v2550_v36  ;;  %v2616_v7 = vand.u32 4294901760, %v289_v50  ;;  %218 = vperm.xlu0 %2312, %v200_v34   ;;  %s2091_s28 = sshll.u32 %s190_s24, 2  ;;  %vm2010_vm2 = vcmp.lt.s32.totalorder %v256_v0, 512 }
  0x19   : > { %s197_s21 = scalar_lea.vmem %s2897_s0, %s2093_s12  ;;  %v371_v46 = vand.u32 4294901760, %v370_v30  ;;  %v403_v11 = vsub.f32 %v2553_v37, %v2589_v57  ;;  %v2624_v12 = vand.u32 4294901760, %v2592_v58  ;;  %v2631_v25 = vand.u32 4294901760, %v2614_v6  ;;  %s192_s30 = scalar_lea.vmem [#allocation3], %s2091_s28 }
  0x1a   : > { %v215_v21 = vld [vmem:[%s197_s21] sm:$0xff]  ;;  %v382_v55 = vand.u32 4294901760, %v381_v43  ;;  %v393_v3 = vand.u32 4294901760, %v392_v56  ;;  %v2402_v43 = vmov 1   ;;  %s2028_s5 = sshll.u32 %s192_s30, 4  ;;  %s2341_s12 = scalar_lea.vmem %s2340_s11, 128  ;;  %s2857_s5 = int_to_ptr.vmem [resolvable:$true] %s2028_s5 }
  0x1b   : > { %v259_v26 = vrot.slane %v215_v21, %v258_v17  ;;  %v252_v27 = vcombine.high %v215_v21, %v215_v21  ;;  %v404_v20 = vand.u32 4294901760, %v403_v11  ;;  %v414_v21 = vsub.f32 %v2592_v58, %v2624_v12  ;;  %s2335_s10 = scalar_lea.vmem %s2857_s5, 64  ;;  %p2342_p0 = scmp.lt.s32.totalorder %s2857_s5, %s2340_s11 }
  0x1c   : > { %v425_v29 = vsub.f32 %v2614_v6, %v2631_v25  ;;  %p2336_p11 = scmp.ne.s32.totalorder %s2857_s5, %s2335_s10  ;;  %p2343_p1 = scmp.lt.s32.totalorder %s2341_s12, %s2335_s10 }
  0x1d   : > { %v267_v31 = vcombine.high %v259_v26, %v259_v26  ;;  %v292_v32 = vsel %vm291_vm1, %v259_v26, 0  ;;  %v266_v33 = vrot.slane %v252_v27, %v258_v17  ;;  %v2634_v26 = vsub.f32 %v289_v50, %v2616_v7 }
  0x1e   : > { %v2547_v35 = vand.u32 4294901760, %v292_v32  ;;  %v415_v27 = vand.u32 4294901760, %v414_v21  ;;  %p2337_p12 = pnand %p2336_p11, %p2471_p5  ;;  %p2344_p2 = por %p2343_p1, %p2342_p0 }
  0x1f   : > { %v294_v40 = vsel %vm291_vm1, %v267_v31, 0  ;;  %v268_v41 = vcombine.high %v266_v33, %v266_v33  ;;  %v296_v42 = vsel %vm291_vm1, %v266_v33, 0  ;;  %v2643_v30 = vand.u32 4294901760, %v2634_v26 }
  0x20   : > { %v2564_v44 = vand.u32 4294901760, %v294_v40  ;;  %v2567_v45 = vsub.f32 %v292_v32, %v2547_v35  ;;  %v2569_v47 = vand.u32 4294901760, %v296_v42  ;;  %v426_v31 = vand.u32 4294901760, %v425_v29  ;;  %p2338_p13 = pneg %p2337_p12 }
  0x21   : > { %v298_v48 = vsel %vm291_vm1, %v268_v41, 0  ;;  %v436_v32 = vsub.f32 %v2634_v26, %v2643_v30  ;;  %v201_v41 = vld [vmem:[%s2899_s2 + $0x8] sm:$0xff] }
  0x22   : > { %301 = vmatprep.subr.mxu0 %v2564_v44  ;;  %v2576_v51 = vand.u32 4294901760, %v298_v48  ;;  %v2579_v52 = vsub.f32 %v296_v42, %v2569_v47  ;;  %v2582_v53 = vsub.f32 %v294_v40, %v2564_v44  ;;  %v452_v54 = vand.u32 4294901760, %v2567_v45  ;;  %v202_v40 = vld [vmem:[%s2899_s2 + $0x10] sm:$0xff]  ;;  %v203_v42 = vld [vmem:[%s2899_s2 + $0x18] sm:$0xff]  ;;  %223 = vperm.xlu0 %2312, %v201_v41   ;;  %p2345_p3 = pnand %p2344_p2, %p2338_p13 }
  0x23   : > { %303 = vmatpush1.msra.mxu0 %v2547_v35  ;;  %v437_v33 = vand.u32 4294901760, %v436_v32  ;;  %228 = vperm.xlu1 %2313, %v202_v40  }
  0x24   : > { %372 = vmatmul.mubr.f32.vlgmr.msra.gmra.mrb[0].mxu0 %v371_v46  ;;  %1060 = vmatprep.subr.mxu1 %v2576_v51  ;;  %v446_v59 = vand.u32 4294901760, %v2582_v53  ;;  %v2597_v60 = vsub.f32 %v298_v48, %v2576_v51  ;;  %v453_v61 = vsub.f32 %v2567_v45, %v452_v54  ;;  %v1211_v62 = vand.u32 4294901760, %v2579_v52  ;;  %v205_v48 = vld [vmem:[%s2899_s2 + $0x28] sm:$0xff] }
  0x25   : > { %1062 = vmatpush1.msra.mxu1 %v2569_v47  ;;  %377 = vmatprep.mubr.f32.mxu0 %v2400_v4 }
  0x26   : > { %1131 = vmatmul.mubr.f32.vlgmr.msra.gmra.mrb[0].mxu1 %v371_v46  ;;  %v447_v63 = vsub.f32 %v2582_v53, %v446_v59  ;;  %v1205_v1 = vand.u32 4294901760, %v2597_v60  ;;  %v1212_v2 = vsub.f32 %v2579_v52, %v1211_v62  ;;  %v454_v5 = vand.u32 4294901760, %v453_v61  ;;  %2314 = vset.pattern.permute.xlu0 %v2402_v43  ;;  %v204_v46 = vld [vmem:[%s2899_s2 + $0x20] sm:$0xff] }
  0x27   : > { %1136 = vmatprep.mubr.f32.mxu1 %v2400_v4  ;;  %233 = vperm.xlu1 %2313, %v203_v42  }
  0x28   : > { %383 = vmatmul.mubr.f32.gmra.mrb[2].mxu0 %v382_v55  ;;  %v448_v9 = vand.u32 4294901760, %v447_v63  ;;  %v1206_v10 = vsub.f32 %v2597_v60, %v1205_v1  ;;  %v1213_v16 = vand.u32 4294901760, %v1212_v2  ;;  %1847 = vperm.xlu0 %2314, %v200_v34  }
  0x29   : > { %388 = vmatprep.mubr.f32.mxu0 %v2400_v4 }
  0x2a   : > { %1142 = vmatmul.mubr.f32.gmra.mrb[2].mxu1 %v382_v55  ;;  %449 = vmatprep.subr.mxu0 %v448_v9  ;;  %v1207_v17 = vand.u32 4294901760, %v1206_v10 }
  0x2b   : > { %455 = vmatpush1.msra.mxu0 %v454_v5  ;;  %1147 = vmatprep.mubr.f32.mxu1 %v2400_v4 }
  0x2c   : > { %394 = vmatmul.mubr.f32.gmra.mrb[4].mxu0 %v393_v3  ;;  %1208 = vmatprep.subr.mxu1 %v1207_v17 }
  0x2d   : > { %1214 = vmatpush1.msra.mxu1 %v1213_v16  ;;  %399 = vmatprep.mubr.f32.mxu0 %v2400_v4 }
  0x2e   : > { %1153 = vmatmul.mubr.f32.gmra.mrb[4].mxu1 %v393_v3  ;;  %570 = vmatprep.subr.mxu0 %v2582_v53 }
  0x2f   : > { %1158 = vmatprep.mubr.f32.mxu1 %v2400_v4  ;;  %1329 = vmatprep.subr.mxu1 %v2597_v60 }
  0x30   : > { %405 = vmatmul.mubr.f32.gmra.mrb[6].mxu0 %v404_v20  ;;  %2315 = vset.pattern.permute.xlu1 %v2402_v43 }
  0x31   : > { %410 = vmatprep.mubr.f32.mxu0 %v2400_v4  ;;  %1851 = vperm.xlu1 %2315, %v201_v41  }
  0x32   : > { %1164 = vmatmul.mubr.f32.gmra.mrb[6].mxu1 %v404_v20  ;;  %1855 = vperm.xlu0 %2314, %v202_v40  }
  0x33   : > { %1169 = vmatprep.mubr.f32.mxu1 %v2400_v4 }
  0x34   : > { %416 = vmatmul.mubr.f32.gmra.mrb[8].mxu0 %v415_v27 }
  0x35   : > { %421 = vmatprep.mubr.f32.mxu0 %v2400_v4  ;;  %2316 = vset.pattern.permute.xlu1 %v2401_v39 }
  0x36   : > { %1175 = vmatmul.mubr.f32.gmra.mrb[8].mxu1 %v415_v27  ;;  %238 = vperm.xlu1 %2316, %v204_v46  }
  0x37   : > { %1180 = vmatprep.mubr.f32.mxu1 %v2400_v4  ;;  %1859 = vperm.xlu0 %2314, %v203_v42  }
  0x38   : > { %427 = vmatmul.mubr.f32.gmra.mrb[10].mxu0 %v426_v31 }
  0x39   : > { %432 = vmatprep.mubr.f32.mxu0 %v2400_v4 }
  0x3a   : > { %1186 = vmatmul.mubr.f32.gmra.mrb[10].mxu1 %v426_v31  ;;  %243 = vperm.xlu1 %2316, %v205_v48  }
  0x3b   : > { %1191 = vmatprep.mubr.f32.mxu1 %v2400_v4  ;;  %1863 = vperm.xlu0 %2314, %v204_v46  }
  0x3c   : > { %438 = vmatmul.mubr.f32.gmra.mrb[12].mxu0 %v437_v33 }
  0x3d   : > { %518 = vmatprep.mubr.f32.mxu0 %v2400_v4 }
  0x3e   : > { %1197 = vmatmul.mubr.f32.gmra.mrb[12].mxu1 %v437_v33 }
  0x3f   : > { %1277 = vmatprep.mubr.f32.mxu1 %v2400_v4 }
  0x40   : > { %520 = vmatmul.mubr.f32.vlgmr.msra.gmra.mrb[0].mxu0 %v2508_v13 }
  0x41   : > { %525 = vmatprep.mubr.f32.mxu0 %v2400_v4  ;;  %573 = vmatpush1.msra.mxu0 %v2567_v45 }
  0x42   : > { %1279 = vmatmul.mubr.f32.vlgmr.msra.gmra.mrb[0].mxu1 %v2508_v13  ;;  %694 = vmatprep.subr.mxu0 %v2564_v44 }
  0x43   : > { %1284 = vmatprep.mubr.f32.mxu1 %v2400_v4  ;;  %1332 = vmatpush1.msra.mxu1 %v2579_v52 }
  0x44   : > { %527 = vmatmul.mubr.f32.gmra.mrb[2].mxu0 %v2510_v14  ;;  %1453 = vmatprep.subr.mxu1 %v2576_v51 }
  0x45   : > { %532 = vmatprep.mubr.f32.mxu0 %v2400_v4 }
  0x46   : > { %1286 = vmatmul.mubr.f32.gmra.mrb[2].mxu1 %v2510_v14 }
  0x47   : > { %1291 = vmatprep.mubr.f32.mxu1 %v2400_v4 }
  0x48   : > { %534 = vmatmul.mubr.f32.gmra.mrb[4].mxu0 %v2512_v15 }
  0x49   : > { %539 = vmatprep.mubr.f32.mxu0 %v2400_v4 }
  0x4a   : > { %1293 = vmatmul.mubr.f32.gmra.mrb[4].mxu1 %v2512_v15 }
  0x4b   : > { %1298 = vmatprep.mubr.f32.mxu1 %v2400_v4 }
  0x4c   : > { %541 = vmatmul.mubr.f32.gmra.mrb[6].mxu0 %v2534_v24 }
  0x4d   : > { %546 = vmatprep.mubr.f32.mxu0 %v2400_v4 }
  0x4e   : > { %1300 = vmatmul.mubr.f32.gmra.mrb[6].mxu1 %v2534_v24 }
  0x4f   : > { %1305 = vmatprep.mubr.f32.mxu1 %v2400_v4 }
  0x50   : > { %548 = vmatmul.mubr.f32.gmra.mrb[8].mxu0 %v2555_v38 }
  0x51   : > { %553 = vmatprep.mubr.f32.mxu0 %v2400_v4 }
  0x52   : > { %1307 = vmatmul.mubr.f32.gmra.mrb[8].mxu1 %v2555_v38 }
  0x53   : > { %1312 = vmatprep.mubr.f32.mxu1 %v2400_v4 }
  0x54   : > { %555 = vmatmul.mubr.f32.gmra.mrb[10].mxu0 %v2572_v49 }
  0x55   : > { %560 = vmatprep.mubr.f32.mxu0 %v2400_v4 }
  0x56   : > { %1314 = vmatmul.mubr.f32.gmra.mrb[10].mxu1 %v2572_v49 }
  0x57   : > { %1319 = vmatprep.mubr.f32.mxu1 %v2400_v4 }
  0x58   : > { %562 = vmatmul.mubr.f32.gmra.mrb[12].mxu0 %v2616_v7 }
  0x59   : > { %636 = vmatprep.mubr.f32.mxu0 %v2400_v4 }
  0x5a   : > { %1321 = vmatmul.mubr.f32.gmra.mrb[12].mxu1 %v2616_v7 }
  0x5b   : > { %1395 = vmatprep.mubr.f32.mxu1 %v2400_v4 }
  0x5c   : > { %639 = vmatmul.mubr.f32.vlgmr.msra.gmra.mrb[0].mxu0 %v2517_v18 }
  0x5d   : > { %644 = vmatprep.mubr.f32.mxu0 %v2400_v4  ;;  %696 = vmatpush1.msra.mxu0 %v2547_v35 }
  0x5e   : > { %1398 = vmatmul.mubr.f32.vlgmr.msra.gmra.mrb[0].mxu1 %v2517_v18  ;;  %826 = vmatprep.subr.mxu0 %v446_v59  ;;  %v206_v18 = vld [vmem:[%s2899_s2 + $0x30] sm:$0x3] }
  0x5f   : > { %1403 = vmatprep.mubr.f32.mxu1 %v2400_v4  ;;  %1455 = vmatpush1.msra.mxu1 %v2569_v47 }
  0x60   : > { %647 = vmatmul.mubr.f32.gmra.mrb[2].mxu0 %v2520_v19  ;;  %1585 = vmatprep.subr.mxu1 %v1205_v1 }
  0x61   : > { %652 = vmatprep.mubr.f32.mxu0 %v2400_v4  ;;  %248 = vperm.xlu1 %2316, %v206_v18  }
  0x62   : > { %1406 = vmatmul.mubr.f32.gmra.mrb[2].mxu1 %v2520_v19  ;;  %1871 = vperm.xlu0 %2314, %v206_v18  }
  0x63   : > { %1411 = vmatprep.mubr.f32.mxu1 %v2400_v4 }
  0x64   : > { %655 = vmatmul.mubr.f32.gmra.mrb[4].mxu0 %v2532_v23 }
  0x65   : > { %660 = vmatprep.mubr.f32.mxu0 %v2400_v4  ;;  %2317 = vset.pattern.permute.xlu1 %v2402_v43 }
  0x66   : > { %1414 = vmatmul.mubr.f32.gmra.mrb[4].mxu1 %v2532_v23  ;;  %1867 = vperm.xlu1 %2317, %v205_v48  }
  0x67   : > { %1419 = vmatprep.mubr.f32.mxu1 %v2400_v4 }
  0x68   : > { %663 = vmatmul.mubr.f32.gmra.mrb[6].mxu0 %v2553_v37 }
  0x69   : > { %668 = vmatprep.mubr.f32.mxu0 %v2400_v4 }
  0x6a   : > { %1422 = vmatmul.mubr.f32.gmra.mrb[6].mxu1 %v2553_v37 }
  0x6b   : > { %1427 = vmatprep.mubr.f32.mxu1 %v2400_v4 }
  0x6c   : > { %671 = vmatmul.mubr.f32.gmra.mrb[8].mxu0 %v2592_v58 }
  0x6d   : > { %676 = vmatprep.mubr.f32.mxu0 %v2400_v4 }
  0x6e   : > { %1430 = vmatmul.mubr.f32.gmra.mrb[8].mxu1 %v2592_v58 }
  0x6f   : > { %1435 = vmatprep.mubr.f32.mxu1 %v2400_v4 }
  0x70   : > { %679 = vmatmul.mubr.f32.gmra.mrb[10].mxu0 %v2614_v6 }
  0x71   : > { %684 = vmatprep.mubr.f32.mxu0 %v2400_v4 }
  0x72   : > { %1438 = vmatmul.mubr.f32.gmra.mrb[10].mxu1 %v2614_v6 }
  0x73   : > { %1443 = vmatprep.mubr.f32.mxu1 %v2400_v4 }
  0x74   : > { %687 = vmatmul.mubr.f32.gmra.mrb[12].mxu0 %v2634_v26 }
  0x75   : > { %759 = vmatprep.mubr.f32.mxu0 %v2400_v4 }
  0x76   : > { %1446 = vmatmul.mubr.f32.gmra.mrb[12].mxu1 %v2634_v26 }
  0x77   : > { %1518 = vmatprep.mubr.f32.mxu1 %v2400_v4 }
  0x78   : > { %763 = vmatmul.mubr.f32.vlgmr.msra.gmra.mrb[0].mxu0 %v2529_v22 }
  0x79   : > { %768 = vmatprep.mubr.f32.mxu0 %v2400_v4  ;;  %830 = vmatpush1.msra.mxu0 %v452_v54 }
  0x7a   : > { %1522 = vmatmul.mubr.f32.vlgmr.msra.gmra.mrb[0].mxu1 %v2529_v22  ;;  %944 = vmatprep.subr.mxu0 %v2564_v44 }
  0x7b   : > { %1527 = vmatprep.mubr.f32.mxu1 %v2400_v4  ;;  %1589 = vmatpush1.msra.mxu1 %v1211_v62 }
  0x7c   : > { %772 = vmatmul.mubr.f32.gmra.mrb[2].mxu0 %v2540_v28  ;;  %1703 = vmatprep.subr.mxu1 %v2576_v51 }
  0x7d   : > { %777 = vmatprep.mubr.f32.mxu0 %v2400_v4 }
  0x7e   : > { %1531 = vmatmul.mubr.f32.gmra.mrb[2].mxu1 %v2540_v28 }
  0x7f   : > { %1536 = vmatprep.mubr.f32.mxu1 %v2400_v4 }
  0x80   : > { %781 = vmatmul.mubr.f32.gmra.mrb[4].mxu0 %v2550_v36 }
  0x81   : > { %786 = vmatprep.mubr.f32.mxu0 %v2400_v4 }
  0x82   : > { %1540 = vmatmul.mubr.f32.gmra.mrb[4].mxu1 %v2550_v36 }
  0x83   : > { %1545 = vmatprep.mubr.f32.mxu1 %v2400_v4 }
  0x84   : > { %790 = vmatmul.mubr.f32.gmra.mrb[6].mxu0 %v2589_v57 }
  0x85   : > { %795 = vmatprep.mubr.f32.mxu0 %v2400_v4 }
  0x86   : > { %1549 = vmatmul.mubr.f32.gmra.mrb[6].mxu1 %v2589_v57 }
  0x87   : > { %1554 = vmatprep.mubr.f32.mxu1 %v2400_v4 }
  0x88   : > { %799 = vmatmul.mubr.f32.gmra.mrb[8].mxu0 %v2624_v12 }
  0x89   : > { %804 = vmatprep.mubr.f32.mxu0 %v2400_v4 }
  0x8a   : > { %1558 = vmatmul.mubr.f32.gmra.mrb[8].mxu1 %v2624_v12 }
  0x8b   : > { %1563 = vmatprep.mubr.f32.mxu1 %v2400_v4 }
  0x8c   : > { %808 = vmatmul.mubr.f32.gmra.mrb[10].mxu0 %v2631_v25 }
  0x8d   : > { %813 = vmatprep.mubr.f32.mxu0 %v2400_v4 }
  0x8e   : > { %1567 = vmatmul.mubr.f32.gmra.mrb[10].mxu1 %v2631_v25 }
  0x8f   : > { %1572 = vmatprep.mubr.f32.mxu1 %v2400_v4 }
  0x90   : > { %817 = vmatmul.mubr.f32.gmra.mrb[12].mxu0 %v2643_v30 }
  0x91   : > { %893 = vmatprep.mubr.f32.mxu0 %v2400_v4 }
  0x92   : > { %1576 = vmatmul.mubr.f32.gmra.mrb[12].mxu1 %v2643_v30 }
  0x93   : > { %1652 = vmatprep.mubr.f32.mxu1 %v2400_v4 }
  0x94   : > { %895 = vmatmul.mubr.f32.vlgmr.msra.gmra.mrb[0].mxu0 %v2508_v13 }
  0x95   : > { %900 = vmatprep.mubr.f32.mxu0 %v2400_v4  ;;  %946 = vmatpush1.msra.mxu0 %v2547_v35 }
  0x96   : > { %1654 = vmatmul.mubr.f32.vlgmr.msra.gmra.mrb[0].mxu1 %v2508_v13 }
  0x97   : > { %1659 = vmatprep.mubr.f32.mxu1 %v2400_v4  ;;  %1705 = vmatpush1.msra.mxu1 %v2569_v47 }
  0x98   : > { %902 = vmatmul.mubr.f32.gmra.mrb[2].mxu0 %v2510_v14 }
  0x99   : > { %907 = vmatprep.mubr.f32.mxu0 %v2400_v4 }
  0x9a   : > { %1661 = vmatmul.mubr.f32.gmra.mrb[2].mxu1 %v2510_v14 }
  0x9b   : > { %1666 = vmatprep.mubr.f32.mxu1 %v2400_v4 }
  0x9c   : > { %909 = vmatmul.mubr.f32.gmra.mrb[4].mxu0 %v2512_v15 }
  0x9d   : > { %914 = vmatprep.mubr.f32.mxu0 %v2400_v4 }
  0x9e   : > { %1668 = vmatmul.mubr.f32.gmra.mrb[4].mxu1 %v2512_v15 }
  0x9f   : > { %1673 = vmatprep.mubr.f32.mxu1 %v2400_v4 }
  0xa0   : > { %916 = vmatmul.mubr.f32.gmra.mrb[6].mxu0 %v2534_v24 }
  0xa1   : > { %921 = vmatprep.mubr.f32.mxu0 %v2400_v4 }
  0xa2   : > { %1675 = vmatmul.mubr.f32.gmra.mrb[6].mxu1 %v2534_v24 }
  0xa3   : > { %1680 = vmatprep.mubr.f32.mxu1 %v2400_v4 }
  0xa4   : > { %923 = vmatmul.mubr.f32.gmra.mrb[8].mxu0 %v2555_v38 }
  0xa5   : > { %928 = vmatprep.mubr.f32.mxu0 %v2400_v4 }
  0xa6   : > { %1682 = vmatmul.mubr.f32.gmra.mrb[8].mxu1 %v2555_v38 }
  0xa7   : > { %1687 = vmatprep.mubr.f32.mxu1 %v2400_v4 }
  0xa8   : > { %930 = vmatmul.mubr.f32.gmra.mrb[10].mxu0 %v2572_v49 }
  0xa9   : > { %935 = vmatprep.mubr.f32.mxu0 %v2400_v4 }
  0xaa   : > { %1689 = vmatmul.mubr.f32.gmra.mrb[10].mxu1 %v2572_v49 }
  0xab   : > { %1694 = vmatprep.mubr.f32.mxu1 %v2400_v4 }
  0xac   : > { %937 = vmatmul.mubr.f32.gmra.mrb[12].mxu0 %v2616_v7 }
  0xad   : > { %1009 = vmatprep.mubr.f32.mxu0 %v2400_v4 }
  0xae   : > { %1696 = vmatmul.mubr.f32.gmra.mrb[12].mxu1 %v2616_v7 }
  0xaf   : > { %1768 = vmatprep.mubr.f32.mxu1 %v2400_v4 }
  0xb0   : > { %1011 = vmatmul.mubr.f32.vlgmr.msra.gmra.mrb[0].mxu0 %v2508_v13 }
  0xb1   : > { %1016 = vmatprep.mubr.f32.mxu0 %v2400_v4 }
  0xb2   : > { %1770 = vmatmul.mubr.f32.vlgmr.msra.gmra.mrb[0].mxu1 %v2508_v13  ;;  %v229_v13 = vpop.permute.xlu1 %228 }
  0xb3   : > { %1775 = vmatprep.mubr.f32.mxu1 %v2400_v4 }
  0xb4   : > { %1018 = vmatmul.mubr.f32.gmra.mrb[2].mxu0 %v2510_v14 }
  0xb5   : > { %1023 = vmatprep.mubr.f32.mxu0 %v2400_v4 }
  0xb6   : > { %1777 = vmatmul.mubr.f32.gmra.mrb[2].mxu1 %v2510_v14  ;;  %v219_v14 = vpop.permute.xlu0 %218 }
  0xb7   : > { %1782 = vmatprep.mubr.f32.mxu1 %v2400_v4 }
  0xb8   : > { %1025 = vmatmul.mubr.f32.gmra.mrb[4].mxu0 %v2512_v15 }
  0xb9   : > { %1030 = vmatprep.mubr.f32.mxu0 %v2400_v4 }
  0xba   : > { %1784 = vmatmul.mubr.f32.gmra.mrb[4].mxu1 %v2512_v15  ;;  %v2832_v15 = vpop.permute.xlu1 %233  ;;  %v224_v19 = vpop.permute.xlu0 %223 }
  0xbb   : > { %1789 = vmatprep.mubr.f32.mxu1 %v2400_v4 }
  0xbc   : > { %1032 = vmatmul.mubr.f32.gmra.mrb[6].mxu0 %v2534_v24 }
  0xbd   : > { %1037 = vmatprep.mubr.f32.mxu0 %v2400_v4 }
  0xbe   : > { %1791 = vmatmul.mubr.f32.gmra.mrb[6].mxu1 %v2534_v24  ;;  %v1852_v23 = vpop.permute.xlu1 %1851  ;;  %v1848_v37 = vpop.permute.xlu0 %1847 }
  0xbf   : > { %1796 = vmatprep.mubr.f32.mxu1 %v2400_v4 }
  0xc0   : > { %1039 = vmatmul.mubr.f32.gmra.mrb[8].mxu0 %v2555_v38 }
  0xc1   : > { %1044 = vmatprep.mubr.f32.mxu0 %v2400_v4 }
  0xc2   : > { %1798 = vmatmul.mubr.f32.gmra.mrb[8].mxu1 %v2555_v38  ;;  %v2834_v56 = vpop.permute.xlu1 %238  ;;  %v1856_v2 = vpop.permute.xlu0 %1855 }
  0xc3   : > { %1803 = vmatprep.mubr.f32.mxu1 %v2400_v4 }
  0xc4   : > { %1046 = vmatmul.mubr.f32.gmra.mrb[10].mxu0 %v2572_v49 }
  0xc5   : > { %1051 = vmatprep.mubr.f32.mxu0 %v2400_v4 }
  0xc6   : > { %1805 = vmatmul.mubr.f32.gmra.mrb[10].mxu1 %v2572_v49  ;;  %v244_v34 = vpop.permute.xlu1 %243 }
  0xc7   : > { %1810 = vmatprep.mubr.f32.mxu1 %v2400_v4 }
  0xc8   : > { %1053 = vmatmul.mubr.f32.gmra.mrb[12].mxu0 %v2616_v7 }
  0xca   : > { %1812 = vmatmul.mubr.f32.gmra.mrb[12].mxu1 %v2616_v7 }
 0x183   : > { %v1012_v22 = vpop.f32.mrb[0].mxu0 }
 0x184   : > { %v2100_v24 = vadd.f32 %v1012_v22, %v219_v14  ;;  %v1014_v28 = vpop.f32.mrb[1].mxu0 }
 0x185   : > { %v2101_v35 = vadd.f32 %v1014_v28, %v219_v14  ;;  %v1771_v36 = vpop.f32.mrb[0].mxu1 }
 0x186   : > { %v2114_v38 = vadd.f32 %v1771_v36, %v219_v14  ;;  %v1773_v44 = vpop.f32.mrb[1].mxu1  ;;  %v1818_v45 = vmax.f32 %v2100_v24, 0.0 }
 0x187   : > { %v1819_v4 = vmax.f32 %v2101_v35, 0.0  ;;  %v2115_v47 = vadd.f32 %v1773_v44, %v219_v14  ;;  %v1019_v49 = vpop.f32.mrb[2].mxu0 }
 0x188   : > { %v1820_v50 = vmax.f32 %v2114_v38, 0.0  ;;  %v2102_v51 = vadd.f32 %v1019_v49, %v224_v19  ;;  %v1021_v52 = vpop.f32.mrb[3].mxu0  ;;  %v1874_v60 = vmul.f32 %v1848_v37, %v1818_v45 }
 0x189   : > { %v1821_v53 = vmax.f32 %v2115_v47, 0.0  ;;  %v2103_v54 = vadd.f32 %v1021_v52, %v224_v19  ;;  %v1778_v55 = vpop.f32.mrb[2].mxu1  ;;  %v1875_v61 = vmul.f32 %v1848_v37, %v1819_v4 }
 0x18a   : > { %v1822_v57 = vmax.f32 %v2102_v51, 0.0  ;;  %v2116_v58 = vadd.f32 %v1778_v55, %v224_v19  ;;  %v1780_v59 = vpop.f32.mrb[3].mxu1  ;;  %v1876_v3 = vmul.f32 %v1848_v37, %v1820_v50 }
 0x18b   : > { %v1823_v62 = vmax.f32 %v2103_v54, 0.0  ;;  %v2117_v63 = vadd.f32 %v1780_v59, %v224_v19  ;;  %v1026_v1 = vpop.f32.mrb[4].mxu0  ;;  %v1877_v10 = vmul.f32 %v1848_v37, %v1821_v53  ;;  %v1860_v19 = vpop.permute.xlu0 %1859 }
 0x18c   : > { %v1824_v5 = vmax.f32 %v2116_v58, 0.0  ;;  %v1878_v6 = vmul.f32 %v1852_v23, %v1822_v57  ;;  %v2104_v7 = vadd.f32 %v1026_v1, %v229_v13  ;;  %v1028_v9 = vpop.f32.mrb[5].mxu0  ;;  %v249_v58 = vpop.permute.xlu1 %248 }
 0x18d   : > { %v1825_v11 = vmax.f32 %v2117_v63, 0.0  ;;  %v1879_v12 = vmul.f32 %v1852_v23, %v1823_v62  ;;  %v2105_v16 = vadd.f32 %v1028_v9, %v229_v13  ;;  %v1785_v17 = vpop.f32.mrb[4].mxu1 }
 0x18e   : > { %v1880_v20 = vmul.f32 %v1852_v23, %v1824_v5  ;;  %v1902_v21 = vadd.f32 %v1878_v6, %v1874_v60  ;;  %v1826_v25 = vmax.f32 %v2104_v7, 0.0  ;;  %v2118_v26 = vadd.f32 %v1785_v17, %v229_v13  ;;  %v1787_v27 = vpop.f32.mrb[5].mxu1 }
 0x18f   : > { %v1881_v29 = vmul.f32 %v1852_v23, %v1825_v11  ;;  %v1915_v30 = vadd.f32 %v1879_v12, %v1875_v61  ;;  %v1827_v31 = vmax.f32 %v2105_v16, 0.0  ;;  %v2119_v32 = vadd.f32 %v1787_v27, %v229_v13  ;;  %v1033_v33 = vpop.f32.mrb[6].mxu0 }
 0x190   : > { %v1882_v39 = vmul.f32 %v1856_v2, %v1826_v25  ;;  %v1828_v40 = vmax.f32 %v2118_v26, 0.0  ;;  %v1928_v41 = vadd.f32 %v1880_v20, %v1876_v3  ;;  %v2106_v42 = vadd.f32 %v1033_v33, %v2832_v15  ;;  %v1035_v43 = vpop.f32.mrb[7].mxu0  ;;  %v1864_v3 = vpop.permute.xlu0 %1863 }
 0x191   : > { %v1883_v46 = vmul.f32 %v1856_v2, %v1827_v31  ;;  %v1829_v48 = vmax.f32 %v2119_v32, 0.0  ;;  %v1941_v18 = vadd.f32 %v1881_v29, %v1877_v10  ;;  %v2107_v14 = vadd.f32 %v1035_v43, %v2832_v15  ;;  %v1792_v22 = vpop.f32.mrb[6].mxu1  ;;  %v1868_v26 = vpop.permute.xlu1 %1867 }
 0x192   : > { %v1903_v24 = vadd.f32 %v1902_v21, %v1882_v39  ;;  %v1884_v23 = vmul.f32 %v1856_v2, %v1828_v40  ;;  %v1830_v28 = vmax.f32 %v2106_v42, 0.0  ;;  %v2120_v13 = vadd.f32 %v1792_v22, %v2832_v15  ;;  %v1794_v35 = vpop.f32.mrb[7].mxu1 }
 0x193   : > { %v1916_v36 = vadd.f32 %v1915_v30, %v1883_v46  ;;  %v1885_v37 = vmul.f32 %v1856_v2, %v1829_v48  ;;  %v1831_v38 = vmax.f32 %v2107_v14, 0.0  ;;  %v2121_v44 = vadd.f32 %v1794_v35, %v2832_v15  ;;  %v1040_v45 = vpop.f32.mrb[8].mxu0 }
 0x194   : > { %v1929_v4 = vadd.f32 %v1928_v41, %v1884_v23  ;;  %v1886_v47 = vmul.f32 %v1860_v19, %v1830_v28  ;;  %v1832_v49 = vmax.f32 %v2120_v13, 0.0  ;;  %v2108_v50 = vadd.f32 %v1040_v45, %v2834_v56  ;;  %v1042_v51 = vpop.f32.mrb[9].mxu0 }
 0x195   : > { %v1942_v52 = vadd.f32 %v1941_v18, %v1885_v37  ;;  %v1887_v53 = vmul.f32 %v1860_v19, %v1831_v38  ;;  %v1833_v54 = vmax.f32 %v2121_v44, 0.0  ;;  %v2109_v55 = vadd.f32 %v1042_v51, %v2834_v56  ;;  %v1799_v57 = vpop.f32.mrb[8].mxu1  ;;  %v1872_v38 = vpop.permute.xlu0 %1871 }
 0x196   : > { %v1904_v59 = vadd.f32 %v1903_v24, %v1886_v47  ;;  %v1888_v60 = vmul.f32 %v1860_v19, %v1832_v49  ;;  %v1834_v61 = vmax.f32 %v2108_v50, 0.0  ;;  %v2122_v62 = vadd.f32 %v1799_v57, %v2834_v56  ;;  %v1801_v15 = vpop.f32.mrb[9].mxu1 }
 0x197   : > { %v1917_v63 = vadd.f32 %v1916_v36, %v1887_v53  ;;  %v1889_v1 = vmul.f32 %v1860_v19, %v1833_v54  ;;  %v1835_v2 = vmax.f32 %v2109_v55, 0.0  ;;  %v2123_v5 = vadd.f32 %v1801_v15, %v2834_v56  ;;  %v1047_v6 = vpop.f32.mrb[10].mxu0 }
 0x198   : > { %v1930_v7 = vadd.f32 %v1929_v4, %v1888_v60  ;;  %v1890_v9 = vmul.f32 %v1864_v3, %v1834_v61  ;;  %v1836_v10 = vmax.f32 %v2122_v62, 0.0  ;;  %v2110_v11 = vadd.f32 %v1047_v6, %v244_v34  ;;  %v1049_v12 = vpop.f32.mrb[11].mxu0 }
 0x199   : > { %v1943_v16 = vadd.f32 %v1942_v52, %v1889_v1  ;;  %v1891_v17 = vmul.f32 %v1864_v3, %v1835_v2  ;;  %v1837_v20 = vmax.f32 %v2123_v5, 0.0  ;;  %v2111_v21 = vadd.f32 %v1049_v12, %v244_v34  ;;  %v1806_v25 = vpop.f32.mrb[10].mxu1 }
 0x19a   : > { %v1892_v27 = vmul.f32 %v1864_v3, %v1836_v10  ;;  %v1838_v29 = vmax.f32 %v2110_v11, 0.0  ;;  %v2124_v30 = vadd.f32 %v1806_v25, %v244_v34  ;;  %v1808_v31 = vpop.f32.mrb[11].mxu1  ;;  %v1905_v32 = vadd.f32 %v1904_v59, %v1890_v9 }
 0x19b   : > { %v1893_v33 = vmul.f32 %v1864_v3, %v1837_v20  ;;  %v1839_v39 = vmax.f32 %v2111_v21, 0.0  ;;  %v2125_v56 = vadd.f32 %v1808_v31, %v244_v34  ;;  %v1918_v40 = vadd.f32 %v1917_v63, %v1891_v17  ;;  %v1054_v41 = vpop.f32.mrb[12].mxu0 }
 0x19c   : > { %v1931_v42 = vadd.f32 %v1930_v7, %v1892_v27  ;;  %v1840_v43 = vmax.f32 %v2124_v30, 0.0  ;;  %v1894_v46 = vmul.f32 %v1868_v26, %v1838_v29  ;;  %v2112_v48 = vadd.f32 %v1054_v41, %v249_v58  ;;  %v1056_v18 = vpop.f32.mrb[13].mxu0 }
 0x19d   : > { %v1944_v14 = vadd.f32 %v1943_v16, %v1893_v33  ;;  %v1841_v19 = vmax.f32 %v2125_v56, 0.0  ;;  %v1895_v22 = vmul.f32 %v1868_v26, %v1839_v39  ;;  %v2113_v24 = vadd.f32 %v1056_v18, %v249_v58  ;;  %v1813_v23 = vpop.f32.mrb[12].mxu1 }
 0x19e   : > { %v1896_v28 = vmul.f32 %v1868_v26, %v1840_v43  ;;  %v1906_v13 = vadd.f32 %v1905_v32, %v1894_v46  ;;  %v1842_v35 = vmax.f32 %v2112_v48, 0.0  ;;  %v2126_v36 = vadd.f32 %v1813_v23, %v249_v58  ;;  %v1815_v37 = vpop.f32.mrb[13].mxu1 }
 0x19f   : > { %v1897_v44 = vmul.f32 %v1868_v26, %v1841_v19  ;;  %v1919_v34 = vadd.f32 %v1918_v40, %v1895_v22  ;;  %v1843_v45 = vmax.f32 %v2113_v24, 0.0  ;;  %v2127_v4 = vadd.f32 %v1815_v37, %v249_v58 }
 0x1a0   : > { %v1932_v47 = vadd.f32 %v1931_v42, %v1896_v28  ;;  %v1898_v49 = vmul.f32 %v1872_v38, %v1842_v35  ;;  %v1844_v50 = vmax.f32 %v2126_v36, 0.0  ;;  %v1954_v27 = vstv %s207_s23 }
 0x1a1   : > { %v1945_v51 = vadd.f32 %v1944_v14, %v1897_v44  ;;  %v1899_v52 = vmul.f32 %v1872_v38, %v1843_v45  ;;  %v1845_v53 = vmax.f32 %v2127_v4, 0.0  ;;  %v2403_v4 = vmov 1966171168  }
 0x1a2   : > { %v1907_v54 = vsel %vm291_vm1, %v1898_v49, 0.0  ;;  %v1900_v55 = vmul.f32 %v1872_v38, %v1844_v50 }
 0x1a3   : > { %v1908_v57 = vadd.f32 %v1907_v54, %v1906_v13  ;;  %v1920_v59 = vsel %vm291_vm1, %v1899_v52, 0.0  ;;  %v1901_v60 = vmul.f32 %v1872_v38, %v1845_v53 }
 0x1a4   : > { %v1921_v61 = vadd.f32 %v1920_v59, %v1919_v34  ;;  %v1933_v62 = vsel %vm291_vm1, %v1900_v55, 0.0 }
 0x1a5   : > { %v1909_v15 = vrot.slane %v1908_v57, 4  ;;  %v1934_v63 = vadd.f32 %v1933_v62, %v1932_v47  ;;  %v1946_v58 = vsel %vm291_vm1, %v1901_v60, 0.0  ;;  %v1986_v47 = vunpack.c.l.s4 %v2403_v4 }
 0x1a6   : > { %v1922_v1 = vrot.slane %v1921_v61, 4  ;;  %v1947_v2 = vadd.f32 %v1946_v58, %v1945_v51 }
 0x1a7   : > { %v1910_v3 = vadd.f32 %v1909_v15, %v1908_v57  ;;  %v1935_v5 = vrot.slane %v1934_v63, 4  ;;  %v1987_v49 = vunpack.c.0.s8 %v1986_v47 }
 0x1a8   : > { %v1923_v6 = vadd.f32 %v1922_v1, %v1921_v61  ;;  %v1948_v7 = vrot.slane %v1947_v2, 4 }
 0x1a9   : > { %v1911_v9 = vrot.slane %v1910_v3, 2  ;;  %v1936_v10 = vadd.f32 %v1935_v5, %v1934_v63  ;;  %v1990_v54 = vsub.s32 %v1987_v49, %v2501_v8 }
 0x1aa   : > { %v1924_v11 = vrot.slane %v1923_v6, 2  ;;  %v1949_v12 = vadd.f32 %v1948_v7, %v1947_v2 }
 0x1ab   : > { %v1912_v16 = vadd.f32 %v1911_v9, %v1910_v3  ;;  %v1937_v17 = vrot.slane %v1936_v10, 2 }
 0x1ac   : > { %v1925_v20 = vadd.f32 %v1924_v11, %v1923_v6  ;;  %v1950_v21 = vrot.slane %v1949_v12, 2 }
 0x1ad   : > { %v1913_v25 = vrot.slane %v1912_v16, 1  ;;  %v1938_v26 = vadd.f32 %v1937_v17, %v1936_v10 }
 0x1ae   : > { %v1926_v29 = vrot.slane %v1925_v20, 1  ;;  %v1951_v30 = vadd.f32 %v1950_v21, %v1949_v12 }
 0x1af   : > { %v1914_v31 = vadd.f32 %v1913_v25, %v1912_v16  ;;  %v1939_v32 = vrot.slane %v1938_v26, 1 }
 0x1b0   : > { %v1927_v33 = vadd.f32 %v1926_v29, %v1925_v20  ;;  %v1952_v39 = vrot.slane %v1951_v30, 1 }
 0x1b1   : > { %v1955_v56 = vadd.f32 %v1954_v27, %v1914_v31  ;;  %v1940_v40 = vadd.f32 %v1939_v32, %v1938_v26 }
 0x1b2   : > { %v1956_v41 = vadd.f32 %v1954_v27, %v1927_v33  ;;  %v1953_v42 = vadd.f32 %v1952_v39, %v1951_v30 }
 0x1b3   : > { %v1959_v43 = vsub.f32 0.0, %v1955_v56  ;;  %v1957_v46 = vadd.f32 %v1954_v27, %v1940_v40 }
 0x1b4   : > { %v1960_v48 = vsub.f32 0.0, %v1956_v41  ;;  %v1958_v18 = vadd.f32 %v1954_v27, %v1953_v42 }
 0x1b5   : > { %v1963_v14 = vmul.f32 1.442695, %v1959_v43  ;;  %v1961_v19 = vsub.f32 0.0, %v1957_v46 }
 0x1b6   : > { %v1965_v22 = vmul.f32 1.442695, %v1960_v48  ;;  %v1962_v24 = vsub.f32 0.0, %v1958_v18 }
 0x1b7   : > { %2319 = vpow2.f32 %v1963_v14  ;;  %v1967_v23 = vmul.f32 1.442695, %v1961_v19 }
 0x1b8   : > { %2321 = vpow2.f32 %v1965_v22  ;;  %v1969_v28 = vmul.f32 1.442695, %v1962_v24 }
 0x1b9   : > { %2323 = vpow2.f32 %v1967_v23 }
 0x1ba   : > { %2325 = vpow2.f32 %v1969_v28 }
 0x1c1   : > { %v2320_v13 = vpop.eup %2319 }
 0x1c2   : > { %v2322_v35 = vpop.eup %2321  ;;  %v1971_v36 = vadd.f32 1.0, %v2320_v13 }
 0x1c3   : > { %v2324_v37 = vpop.eup %2323  ;;  %v1972_v38 = vadd.f32 1.0, %v2322_v35 }
 0x1c4   : > { %v2326_v44 = vpop.eup %2325  ;;  %2327 = vrcp.f32 %v1971_v36  ;;  %v1973_v34 = vadd.f32 1.0, %v2324_v37 }
 0x1c5   : > { %2329 = vrcp.f32 %v1972_v38  ;;  %v1974_v45 = vadd.f32 1.0, %v2326_v44 }
 0x1c6   : > { %2331 = vrcp.f32 %v1973_v34 }
 0x1c7   : > { %2333 = vrcp.f32 %v1974_v45 }
 0x1ce   : > { %v2328_v50 = vpop.eup %2327 }
 0x1cf   : > { %v2330_v51 = vpop.eup %2329 }
 0x1d0   : > { %v2332_v52 = vpop.eup %2331  ;;  %v1983_v53 = vcombine.low %v2328_v50, %v2330_v51 }
 0x1d1   : > { %v2334_v55 = vpop.eup %2333 }
 0x1d2   : > { %v1984_v57 = vcombine.low %v2332_v52, %v2334_v55  ;;  %v1991_v59 = vrot.slane %v1983_v53, %v1990_v54 }
 0x1d4   : > { %v1998_v60 = vrot.slane %v1984_v57, %v1990_v54 }
 0x1d6   : > { %v1999_v61 = vcombine.low %v1991_v59, %v1998_v60 }
 0x1d8   : > { %v2006_v62 = vrot.slane %v1999_v61, %v1990_v54 }
 0x1da   : > { %2012 = vst.msk [vmem:[%s192_s30] sm:$0xf] %vm2010_vm2, %v2006_v62 }
 0x1db   : > { %2348 = shalt.err (!%p2345_p3)
}
 0x1dc   : > { %s2349_s13 = scalar_lea.hbm %s2855_s8, 64  ;;  %s2353_s16 = scalar_lea.hbm %s2901_s4, 128 }
 0x1dd   : > { %p2350_p4 = scmp.ne.s32.totalorder %s2855_s8, %s2349_s13  ;;  %p2354_p9 = scmp.lt.u32.totalorder %s2855_s8, %s2901_s4 }
 0x1de   : > { %p2355_p10 = scmp.lt.u32.totalorder %s2353_s16, %s2349_s13  ;;  %p2357_p12 = scmp.lt.u32.totalorder %s2349_s13, %s2855_s8 }
 0x1df   : > { %p2351_p7 = pnand %p2350_p4, %p2471_p5 }
 0x1e0   : > { %p2356_p11 = por %p2355_p10, %p2354_p9 }
 0x1e1   : > { %p2352_p8 = pneg %p2351_p7 }
 0x1e2   : > { %p2358_p13 = por %p2357_p12, %p2356_p11 }
 0x1e4   : > { %p2359_p0 = pnand %p2358_p13, %p2352_p8 }
 0x1e6   : > { %2362 = shalt.err (!%p2359_p0)
}
 0x1e7   : > { %2268 = dma.vmem_to_hbm [thread:$0]  (%p2471_p5), %s2857_s5, 64, %s2855_s8, %s2014_s9  }
 0x1e8 PF: > { %p2274_p1 = scmp.ge.s32.totalorder %s2397_s20, 2  ;;  %s2040_s24 = sand.u32 1, %s2385_s17  }
 0x1e9   : > { %s2041_s28 = scalar_lea.sflag [#allocation4], %s2040_s24 }
 0x1ea   : > { %p2271_p2 = pnand %p2274_p1, %p2475_p6 }
 0x1ec   : > { %2380 = dma.done.wait (!%p2271_p2), %s2041_s28, 64  }
 0x1ed   : > { %2382 = vsyncadd (!%p2271_p2), %s2041_s28, 4294967232  ;;  %p15_p3 = scmp.ge.s32.totalorder %s2458_s22, 4   ;;  %s2905_s17 = smov %s2389_s18 }
 0x1ee   : > { %s2906_s18 = smov %s2393_s19  ;;  %s2907_s19 = smov %s2469_s25 }
 0x1ef   : > { %s2908_s20 = smov %s2458_s22  ;;  %17 = sbr.rel (!%p15_p3) target bundleno = 5 (0x5), region = 71 }
 0x1f6   :  { %2046 = vsyncpa [#allocation4], 1 }
 0x1f7   :  { %2048 = vsyncpa [#allocation4 + $0x1], 1 }

</bundles_post_ra>
